<compile_context>
chip_gen: v7x
topology: tpu7x:2x2x1
jax: 0.10.0
libtpu: 0.0.40
codegen_flags: <defaults>
</compile_context>

<pallas_src>
import jax
import jax.numpy as jnp
from jax.experimental import pallas as pl
from jax.experimental.pallas import tpu as pltpu


def cl_attn_pool_kernel(x_ref, w_ref, bw_ref, v_ref, bv_ref, ctx_ref):
    """AttentionHead pooling for a block of TB batch rows.

    x_ref  : [TB, S, H]  bf16   hidden states
    w_ref  : [H, Hd]     bf16   AttentionHead.W weight
    bw_ref : [1, Hd]     f32    AttentionHead.W bias
    v_ref  : [1, Hd]     f32    AttentionHead.V weight (as a row)
    bv_ref : [1, 1]      f32    AttentionHead.V bias
    ctx_ref: [TB, H]     f32    pooled context vectors (lane-dense output)
    """
    TB, S, H = x_ref.shape
    Hd = w_ref.shape[1]

    x_blk = x_ref[...]                                           # [TB, S, H] bf16
    x2d = x_blk.reshape(TB * S, H)

    # att = tanh(x @ W + b_W): one large bf16 MXU matmul for the whole block,
    # f32 accumulation, f32 elementwise math afterwards.
    att = jnp.tanh(
        jnp.dot(x2d, w_ref[...], preferred_element_type=jnp.float32)
        + bw_ref[...]
    )                                                            # [TB*S, Hd] f32

    # score = att @ V + b_V as a VPU multiply + lane reduce (Hd -> 1); an
    # [., Hd] x [Hd, 1] matmul would waste all but one MXU column.
    att3 = att.reshape(TB, S, Hd)
    score = jnp.sum(att3 * v_ref[...], axis=-1) + bv_ref[...]    # [TB, S] f32

    # softmax over the sequence axis (dim=1 in the PyTorch model).
    m = jnp.max(score, axis=-1, keepdims=True)
    e = jnp.exp(score - m)
    denom = jnp.sum(e, axis=-1, keepdims=True)
    attn = e * pl.reciprocal(denom, approx=True)                 # [TB, S] f32

    # context = sum_s attn * x as a batched bf16 contraction over S (MXU),
    # f32 accumulation.
    ctx = jnp.einsum(
        "bqs,bsh->bqh",
        attn[:, None, :].astype(jnp.bfloat16),
        x_blk,
        preferred_element_type=jnp.float32,
    ).reshape(TB, H)                                             # [TB, H] f32

    ctx_ref[...] = ctx.astype(ctx_ref.dtype)


def cl_model_forward(x, params, *, block_b=8, vmem_limit_bytes=None):
    """Forward pass of CLModel downstream of the transformer backbone.

    x: [B, S, H] float32 hidden states (output of automodel(**xb)[0]).
    """
    B, S, H = x.shape
    Hd = params["W"].shape[1]

    # TB batch rows per grid step; pad B so the grid tiles evenly.  Padded rows
    # (zeros) produce a harmless uniform softmax and a zero context vector.
    TB = block_b
    B_pad = TB * pl.cdiv(B, TB)

    x_p = x.astype(jnp.bfloat16)
    if B_pad != B:
        x_p = jnp.pad(x_p, ((0, B_pad - B), (0, 0), (0, 0)))

    w_bf16 = params["W"].astype(jnp.bfloat16)                # [H, Hd] bf16 (MXU operand)
    b_w = params["b_W"].astype(jnp.float32)                  # [1, Hd]
    v_row = params["V"].reshape(1, Hd).astype(jnp.float32)   # [1, Hd] for the VPU reduce
    b_v = params["b_V"].reshape(1, 1).astype(jnp.float32)    # [1, 1]

    grid = (B_pad // TB,)

    flops = (2 * B_pad * S * H * Hd          # x @ W
             + 2 * B_pad * S * Hd            # V reduction
             + 2 * B_pad * S * H)            # context contraction
    transcendentals = B_pad * S * Hd + B_pad * S   # tanh + exp
    bytes_accessed = (x_p.size * 2 + w_bf16.size * 2
                      + (b_w.size + v_row.size + b_v.size) * 4
                      + B_pad * H * 4)

    ctx = pl.pallas_call(
        cl_attn_pool_kernel,
        out_shape=jax.ShapeDtypeStruct((B_pad, H), jnp.float32),
        grid_spec=pltpu.PrefetchScalarGridSpec(
            num_scalar_prefetch=0,
            grid=grid,
            in_specs=[
                pl.BlockSpec((TB, S, H), lambda b: (b, 0, 0)),   # x block (bf16)
                pl.BlockSpec((H, Hd), lambda b: (0, 0)),         # W (bf16, resident)
                pl.BlockSpec((1, Hd), lambda b: (0, 0)),         # b_W
                pl.BlockSpec((1, Hd), lambda b: (0, 0)),         # V row
                pl.BlockSpec((1, 1), lambda b: (0, 0)),          # b_V
            ],
            out_specs=pl.BlockSpec((TB, H), lambda b: (b, 0)),   # lane-dense ctx slab
        ),
        compiler_params=pltpu.CompilerParams(
            dimension_semantics=("parallel",),      # lets v7x shard batch blocks across 2 TCs
            vmem_limit_bytes=vmem_limit_bytes,      # raise for big TB/S/H (e.g. v7x 64 MiB VMEM)
        ),
        cost_estimate=pl.CostEstimate(
            flops=flops,
            transcendentals=transcendentals,
            bytes_accessed=bytes_accessed,
        ),
    )(x_p, w_bf16, b_w, v_row, b_v)

    ctx = ctx[:B]                                              # drop batch padding

    # dropout(p=0.1) in eval mode -> identity; final Linear(H -> 1) is a tiny
    # GEMV, done in plain XLA so the kernel's output stays lane-dense.
    return ctx @ params["W_l"] + params["b_l"]


def init_params(key, hidden, hidden_dim):
    """Deterministic init mimicking nn.Linear's uniform(-1/sqrt(fan_in), +)."""
    ks = jax.random.split(key, 6)

    def lin(kw, kb, fan_in, fan_out):
        bound = 1.0 / jnp.sqrt(fan_in)
        w = jax.random.uniform(kw, (fan_in, fan_out), jnp.float32, -bound, bound)
        b = jax.random.uniform(kb, (1, fan_out), jnp.float32, -bound, bound)
        return w, b

    W, b_W = lin(ks[0], ks[1], hidden, hidden_dim)       # AttentionHead.W
    V, b_V = lin(ks[2], ks[3], hidden_dim, 1)            # AttentionHead.V
    W_l, b_l = lin(ks[4], ks[5], hidden, 1)              # CLModel.linear
    return {"W": W, "b_W": b_W, "V": V, "b_V": b_V, "W_l": W_l, "b_l": b_l}


def reference_forward(x, p):
    """Pure-f32 JAX reference matching the PyTorch module (eval mode)."""
    att = jnp.tanh(jnp.einsum("bsh,hd->bsd", x, p["W"]) + p["b_W"])
    score = jnp.einsum("bsd,do->bso", att, p["V"]) + p["b_V"]
    attn = jax.nn.softmax(score, axis=1)
    ctx = jnp.sum(attn * x, axis=1)
    return ctx @ p["W_l"] + p["b_l"]


if __name__ == "__main__":
    B, S, H = 2, 8, 32          # batch, seq_len, hidden_size (small synthetic config)
    Hd = H                      # AttentionHead hidden_dimension == hidden_size

    key = jax.random.PRNGKey(0)
    kx, kp = jax.random.split(key)
    x = jax.random.normal(kx, (B, S, H), dtype=jnp.float32)
    params = init_params(kp, H, Hd)

    out = jax.block_until_ready(cl_model_forward(x, params))
    ref = reference_forward(x, params)

    assert out.shape == (B, 1)
    # bf16 MXU operands + approx softmax reciprocal => looser tolerance than pure f32.
    assert jnp.allclose(out, ref, atol=2e-2, rtol=2e-2), (out, ref)

    print("KERNEL_OK")
</pallas_src>

<mosaic_0001>
module attributes {stable_mosaic.version = 11 : i64} {
  func.func @cl_attn_pool_kernel(%arg0: i32, %arg1: memref<8x8x32xbf16, #tpu.memory_space<vmem>>, %arg2: memref<32x32xbf16, #tpu.memory_space<vmem>>, %arg3: memref<1x32xf32, #tpu.memory_space<vmem>>, %arg4: memref<1x32xf32, #tpu.memory_space<vmem>>, %arg5: memref<1x1xf32, #tpu.memory_space<vmem>>, %arg6: memref<8x32xf32, #tpu.memory_space<vmem>>) attributes {dimension_semantics = [#tpu.dimension_semantics<parallel>], iteration_bounds = array<i64: 1>, scalar_prefetch = 0 : i64, scratch_operands = 0 : i64, tpu.core_type = #tpu.core_type<tc>, window_params = [{transform_indices = @transform_0, window_bounds = array<i64: 8, 8, 32>}, {pipeline_mode = #tpu.pipeline_mode<synchronous>, transform_indices = @transform_1, window_bounds = array<i64: 32, 32>}, {pipeline_mode = #tpu.pipeline_mode<synchronous>, transform_indices = @transform_2, window_bounds = array<i64: 1, 32>}, {pipeline_mode = #tpu.pipeline_mode<synchronous>, transform_indices = @transform_3, window_bounds = array<i64: 1, 32>}, {pipeline_mode = #tpu.pipeline_mode<synchronous>, transform_indices = @transform_4, window_bounds = array<i64: 1, 1>}, {transform_indices = @transform_5, window_bounds = array<i64: 8, 32>}]} {
    %c0 = arith.constant 0 : index
    %c0_0 = arith.constant 0 : index
    %c0_1 = arith.constant 0 : index
    %0 = vector.load %arg1[%c0, %c0_0, %c0_1] : memref<8x8x32xbf16, #tpu.memory_space<vmem>>, vector<8x8x32xbf16>
    %1 = vector.shape_cast %0 : vector<8x8x32xbf16> to vector<64x32xbf16>
    %c0_2 = arith.constant 0 : index
    %c0_3 = arith.constant 0 : index
    %2 = vector.load %arg2[%c0_2, %c0_3] : memref<32x32xbf16, #tpu.memory_space<vmem>>, vector<32x32xbf16>
    %cst = arith.constant dense<0.000000e+00> : vector<64x32xf32>
    %3 = tpu.matmul %1, %2, %cst {dimension_numbers = #tpu.dot_dimension_numbers<[1], [0], [0], [1], [0, 0, 1, 1], [], []>} : vector<64x32xbf16>, vector<32x32xbf16>, vector<64x32xf32> -> vector<64x32xf32>
    %c0_4 = arith.constant 0 : index
    %c0_5 = arith.constant 0 : index
    %4 = vector.load %arg3[%c0_4, %c0_5] : memref<1x32xf32, #tpu.memory_space<vmem>>, vector<1x32xf32>
    %5 = vector.broadcast %4 : vector<1x32xf32> to vector<64x32xf32>
    %6 = arith.addf %3, %5 : vector<64x32xf32>
    %7 = math.tanh %6 : vector<64x32xf32>
    %8 = vector.shape_cast %7 : vector<64x32xf32> to vector<8x8x32xf32>
    %c0_6 = arith.constant 0 : index
    %c0_7 = arith.constant 0 : index
    %9 = vector.load %arg4[%c0_6, %c0_7] : memref<1x32xf32, #tpu.memory_space<vmem>>, vector<1x32xf32>
    %10 = vector.shape_cast %9 : vector<1x32xf32> to vector<1x1x32xf32>
    %11 = vector.broadcast %10 : vector<1x1x32xf32> to vector<8x8x32xf32>
    %12 = arith.mulf %8, %11 : vector<8x8x32xf32>
    %cst_8 = arith.constant dense<0.000000e+00> : vector<8x8xf32>
    %13 = vector.multi_reduction <add>, %12, %cst_8 [2] : vector<8x8x32xf32> to vector<8x8xf32>
    %c0_9 = arith.constant 0 : index
    %c0_10 = arith.constant 0 : index
    %14 = vector.load %arg5[%c0_9, %c0_10] : memref<1x1xf32, #tpu.memory_space<vmem>>, vector<1x1xf32>
    %15 = vector.broadcast %14 : vector<1x1xf32> to vector<8x8xf32>
    %16 = arith.addf %13, %15 : vector<8x8xf32>
    %cst_11 = arith.constant dense<0xFF800000> : vector<8xf32>
    %17 = vector.multi_reduction <maximumf>, %16, %cst_11 [1] : vector<8x8xf32> to vector<8xf32>
    %18 = vector.shape_cast %17 : vector<8xf32> to vector<8x1xf32>
    %19 = vector.broadcast %18 : vector<8x1xf32> to vector<8x8xf32>
    %20 = arith.subf %16, %19 : vector<8x8xf32>
    %21 = math.exp %20 : vector<8x8xf32>
    %cst_12 = arith.constant dense<0.000000e+00> : vector<8xf32>
    %22 = vector.multi_reduction <add>, %21, %cst_12 [1] : vector<8x8xf32> to vector<8xf32>
    %23 = vector.shape_cast %22 : vector<8xf32> to vector<8x1xf32>
    %24 = tpu.reciprocal %23 {approx = true} : vector<8x1xf32> -> vector<8x1xf32>
    %25 = vector.broadcast %24 : vector<8x1xf32> to vector<8x8xf32>
    %26 = arith.mulf %21, %25 : vector<8x8xf32>
    %27 = vector.shape_cast %26 : vector<8x8xf32> to vector<8x1x8xf32>
    %28 = arith.truncf %27 : vector<8x1x8xf32> to vector<8x1x8xbf16>
    "tpu.trace_start"() <{level = 10 : i32, message = "bqs,bsh->bqh"}> : () -> ()
    %cst_13 = arith.constant dense<0.000000e+00> : vector<8x1x32xf32>
    %29 = tpu.matmul %28, %0, %cst_13 {dimension_numbers = #tpu.dot_dimension_numbers<[2], [1], [1], [2], [0, 0, 0, 1, 1, 2], [0], [0]>} : vector<8x1x8xbf16>, vector<8x8x32xbf16>, vector<8x1x32xf32> -> vector<8x1x32xf32>
    "tpu.trace_stop"() : () -> ()
    %30 = vector.shape_cast %29 : vector<8x1x32xf32> to vector<8x32xf32>
    %c0_14 = arith.constant 0 : index
    %c0_15 = arith.constant 0 : index
    %31 = vector.load %arg6[%c0_14, %c0_15] : memref<8x32xf32, #tpu.memory_space<vmem>>, vector<8x32xf32>
    tpu.vector_store %arg6[%c0_14, %c0_15], %30 {strides = array<i32>} : memref<8x32xf32, #tpu.memory_space<vmem>>, vector<8x32xf32>,
    return
  }
  func.func @transform_0(%arg0: i32) -> (i32, i32, i32) {
    %c0_i32 = arith.constant 0 : i32
    %c0_i32_0 = arith.constant 0 : i32
    %c0_i32_1 = arith.constant 0 : i32
    return %arg0, %c0_i32, %c0_i32_0 : i32, i32, i32
  }
  func.func @transform_1(%arg0: i32) -> (i32, i32) {
    %c0_i32 = arith.constant 0 : i32
    %c0_i32_0 = arith.constant 0 : i32
    %c0_i32_1 = arith.constant 0 : i32
    return %c0_i32, %c0_i32_0 : i32, i32
  }
  func.func @transform_2(%arg0: i32) -> (i32, i32) {
    %c0_i32 = arith.constant 0 : i32
    %c0_i32_0 = arith.constant 0 : i32
    %c0_i32_1 = arith.constant 0 : i32
    return %c0_i32, %c0_i32_0 : i32, i32
  }
  func.func @transform_3(%arg0: i32) -> (i32, i32) {
    %c0_i32 = arith.constant 0 : i32
    %c0_i32_0 = arith.constant 0 : i32
    %c0_i32_1 = arith.constant 0 : i32
    return %c0_i32, %c0_i32_0 : i32, i32
  }
  func.func @transform_4(%arg0: i32) -> (i32, i32) {
    %c0_i32 = arith.constant 0 : i32
    %c0_i32_0 = arith.constant 0 : i32
    %c0_i32_1 = arith.constant 0 : i32
    return %c0_i32, %c0_i32_0 : i32, i32
  }
  func.func @transform_5(%arg0: i32) -> (i32, i32) {
    %c0_i32 = arith.constant 0 : i32
    %c0_i32_0 = arith.constant 0 : i32
    return %arg0, %c0_i32 : i32, i32
  }
}

</mosaic_0001>

<bundles_post_ra>
// kernel: tpu_custom_call.1
= control target key start
LH: loop header
LB: loop body
LE: loop exit
PB: predicated region body
PF: predicated region fallthrough
CT: control target
= control target key end

     0   :  { %s1507_s0 = inlined_call_operand.hbm [shape: bf16[8,8,32], index: 0, kind: input, shape index: {}]   ;;  %s1508_s1 = inlined_call_operand.hbm [shape: bf16[32,32], index: 1, kind: input, shape index: {}]   ;;  %s1509_s2 = inlined_call_operand.vmem [shape: f32[1,32], index: 2, kind: input, shape index: {}]   ;;  %s1510_s3 = inlined_call_operand.vmem [shape: f32[1,32], index: 3, kind: input, shape index: {}]   ;;  %s1511_s4 = inlined_call_operand.<no memory space> [shape: f32[1,1], index: 4, kind: input, shape index: {}]   ;;  %s1512_s5 = inlined_call_operand.hbm [shape: f32[8,32], index: 5, kind: output, shape index: {}]  }
   0x1   :  { %v10_v0 = vstv %s1511_s4 }
   0x2   :  { %11 = vst [vmem:[#allocation2] sm:$0x1] %v10_v0 }
   0x3   :  { %12 = vsyncpa [#allocation4], 0 }
   0x4   :  { %13 = vsyncpa [#allocation7], 0 }
   0x5   :  { %14 = vsyncpa [#allocation5], 0  ;;  %s1219_s20 = smov [#allocation3]   ;;  %s1147_s24 = scalar_lea.hbm %s1507_s0, 512 }
   0x6   :  { %s20_s21 = sshll.u32 %s1219_s20, 4  ;;  %p1148_p0 = scmp.ne.s32.totalorder %s1507_s0, %s1147_s24  ;;  %s21_s21 = int_to_ptr.vmem [resolvable:$true] %s20_s21 }
   0x7   :  { %p1151_p1 = scmp.lt.u32.totalorder %s1147_s24, %s1507_s0 }
   0x9   :  { %p1153_p2 = pnand %p1151_p1, %p1148_p0 }
   0xb   :  { %1156 = shalt.err (!%p1153_p2)
}
   0xc   :  { %s1157_s4 = scalar_lea.vmem %s21_s21, 512  ;;  %p1162_p4 = scmp.lt.s32.totalorder %s21_s21, %s21_s21 }
   0xd   :  { %p1158_p3 = scmp.ne.s32.totalorder %s21_s21, %s1157_s4  ;;  %p1163_p5 = scmp.lt.s32.totalorder %s1157_s4, %s1157_s4 }
   0xf   :  { %p1164_p6 = por %p1163_p5, %p1162_p4 }
  0x11   :  { %p1165_p7 = pnand %p1164_p6, %p1158_p3 }
  0x13   :  { %1168 = shalt.err (!%p1165_p7)
}
  0x14   :  { %s1220_s29 = smov 64   ;;  %s1221_s30 = smov 4  }
  0x15   :  { %26 = dma.hbm_to_vmem [thread:$0]  %s1507_s0, 512, %s21_s21, [#allocation4], %s1220_s29, %s1220_s29, %s1221_s30  }
  0x16   :  { %s1222_s8 = smov [#allocation6]   ;;  %s1169_s12 = scalar_lea.hbm %s1508_s1, 256 }
  0x17   :  { %s32_s9 = sshll.u32 %s1222_s8, 4  ;;  %p1170_p8 = scmp.ne.s32.totalorder %s1508_s1, %s1169_s12  ;;  %s33_s9 = int_to_ptr.vmem [resolvable:$true] %s32_s9 }
  0x18   :  { %p1173_p9 = scmp.lt.u32.totalorder %s1169_s12, %s1508_s1 }
  0x1a   :  { %p1175_p10 = pnand %p1173_p9, %p1170_p8 }
  0x1c   :  { %1178 = shalt.err (!%p1175_p10)
}
  0x1d   :  { %s1179_s17 = scalar_lea.vmem %s33_s9, 256  ;;  %p1184_p12 = scmp.lt.s32.totalorder %s33_s9, %s33_s9 }
  0x1e   :  { %p1180_p11 = scmp.ne.s32.totalorder %s33_s9, %s1179_s17  ;;  %p1185_p13 = scmp.lt.s32.totalorder %s1179_s17, %s1179_s17 }
  0x20   :  { %p1186_p0 = por %p1185_p13, %p1184_p12 }
  0x22   :  { %p1187_p1 = pnand %p1186_p0, %p1180_p11 }
  0x24   :  { %1190 = shalt.err (!%p1187_p1)
}
  0x25   :  { %38 = dma.hbm_to_vmem [thread:$0]  %s1508_s1, 256, %s33_s9, [#allocation7], %s1220_s29, %s1220_s29, %s1221_s30  }
  0x26   :  { %1213 = dma.done.wait [#allocation4], 512  }
  0x27   :  { %1214 = vsyncadd [#allocation4], 4294966784 }
  0x28   :  { %1215 = dma.done.wait [#allocation7], 256  }
  0x29   :  { %1216 = vsyncadd [#allocation7], 4294967040  ;;  %v1107_v1 = vld [vmem:[#allocation6] sm:$0xff]   ;;  %v1108_v2 = vld [vmem:[#allocation6 + $0x8] sm:$0xff]   ;;  %vm103_vm0 = vcmask 261120   ;;  %v1223_v15 = vmov 0   ;;  %v254_v63 = vlaneseq }
  0x2a   :  { %1037 = vmatprep.subr.bf16.mxu0 %v1107_v1  ;;  %v1284_v3 = vld [vmem:[#allocation3] sm:$0xf]  ;;  %v1286_v4 = vld [vmem:[#allocation3 + $0x4] sm:$0xf]  ;;  %v1290_v6 = vld [vmem:[#allocation3 + $0x8] sm:$0xf]  ;;  %1105 = vset.pattern.permute.xlu0 %v1223_v15 }
  0x2b   :  { %1038 = vmatpush3.bf16.msra.mxu0 %v1107_v1  ;;  %v995_v5 = vcombine.low %v1284_v3, %v1286_v4  ;;  %v1292_v7 = vld [vmem:[#allocation3 + $0xc] sm:$0xf]  ;;  %v1294_v8 = vld [vmem:[#allocation3 + $0x10] sm:$0xf]  ;;  %v1296_v9 = vld [vmem:[#allocation3 + $0x14] sm:$0xf]  ;;  %1106 = vset.pattern.permute.xlu1 %v1223_v15 }
  0x2c   :  { %1039 = vmatprep.subr.bf16.mxu0 %v1108_v2  ;;  %v996_v10 = vcombine.low %v1290_v6, %v1292_v7  ;;  %v997_v11 = vcombine.low %v1294_v8, %v1296_v9  ;;  %v1305_v12 = vld [vmem:[#allocation3 + $0x18] sm:$0xf]  ;;  %v1307_v13 = vld [vmem:[#allocation3 + $0x1c] sm:$0xf]  ;;  %v255_v1 = vand.u32 127, %v254_v63  ;;  %vm288_vm1 = vcmask 1041409  }
  0x2d   :  { %1041 = vmatprep.mubr.msk.bf16.mxu0 %vm103_vm0, %v995_v5  ;;  %v998_v14 = vcombine.low %v1305_v12, %v1307_v13  ;;  %v994_v16 = vld [vmem:[%s1509_s2] ss:$0 sm:$0xff]  ;;  %vm290_vm2 = vcmask 1042434   ;;  %vm292_vm3 = vcmask 1043459   ;;  %vm294_vm4 = vcmask 1044484  }
  0x2e   :  { %v1005_v32 = vld [vmem:[%s1510_s3] ss:$0 sm:$0xff]  ;;  %vm296_vm5 = vcmask 1045509   ;;  %vm298_vm6 = vcmask 1046534   ;;  %vm300_vm7 = vcmask 1047559   ;;  %vm303_vm8 = vcmask 64512  }
  0x2f   :  { %1040 = vmatpush3.bf16.msra.mxu0 %v1108_v2  ;;  %v1006_v58 = vld [vmem:[#allocation2] ss:$0 sm:$0xff]  ;;  %v1326_v2 = vshrl.u32 %v254_v63, 7  ;;  %vm518_vm9 = vcmask 1043456   ;;  %vm1225_vm10 = vmmov 0   ;;  %s1226_s3 = smov [#allocation8]  }
  0x30   :  { %s984_s21 = sshll.u32 %s1226_s3, 4  ;;  %s985_s21 = int_to_ptr.vmem [resolvable:$true] %s984_s21 }
  0x31   :  { %v334_v63 = vsub.s32 6, %v1326_v2  ;;  %s1191_s22 = scalar_lea.vmem %s985_s21, 128  ;;  %p1196_p3 = scmp.lt.s32.totalorder %s985_s21, %s985_s21 }
  0x32   :  { %1042 = vmatmul.mubr.msk.bf16.vlgmr.msra.gmra.mrb[0].mxu0 %vm103_vm0, %v996_v10  ;;  %p1192_p2 = scmp.ne.s32.totalorder %s985_s21, %s1191_s22  ;;  %p1197_p4 = scmp.lt.s32.totalorder %s1191_s22, %s1191_s22 }
  0x33   :  { %1045 = vmatprep.mubr.msk.bf16.mxu0 %vm103_vm0, %v997_v11  ;;  %v1329_v11 = vsub.s32 %v255_v1, %v1326_v2 }
  0x34   :  { %p1198_p5 = por %p1197_p4, %p1196_p3 }
  0x36   :  { %p1199_p6 = pnand %p1198_p5, %p1192_p2 }
  0x3a   :  { %1046 = vmatmul.mubr.msk.bf16.gmra.mrb[4].mxu0 %vm103_vm0, %v998_v14 }
 0x105   :  { %v1043_v17 = vpop.f32.mrb[0].mxu0 }
 0x106   :  { %v159_v18 = vadd.f32 %v1043_v17, %v994_v16  ;;  %v150_v19 = vpop.f32.mrb[1].mxu0 }
 0x107   :  { %v151_v20 = vadd.f32 %v994_v16, %v150_v19  ;;  %v1044_v21 = vpop.f32.mrb[2].mxu0 }
 0x108   :  { %1113 = vtanh.f32 %v159_v18  ;;  %v162_v22 = vadd.f32 %v1044_v21, %v994_v16  ;;  %v153_v23 = vpop.f32.mrb[3].mxu0 }
 0x109   :  { %1115 = vtanh.f32 %v151_v20  ;;  %v154_v24 = vadd.f32 %v994_v16, %v153_v23 }
 0x10a   :  { %1117 = vtanh.f32 %v162_v22 }
 0x10b   :  { %1119 = vtanh.f32 %v154_v24 }
 0x10d   :  { %v1047_v25 = vpop.f32.mrb[4].mxu0 }
 0x10e   :  { %v175_v26 = vadd.f32 %v1047_v25, %v994_v16  ;;  %v166_v27 = vpop.f32.mrb[5].mxu0 }
 0x10f   :  { %v167_v28 = vadd.f32 %v994_v16, %v166_v27  ;;  %v1048_v29 = vpop.f32.mrb[6].mxu0 }
 0x110   :  { %1121 = vtanh.f32 %v175_v26  ;;  %v178_v30 = vadd.f32 %v1048_v29, %v994_v16  ;;  %v169_v31 = vpop.f32.mrb[7].mxu0 }
 0x111   :  { %1123 = vtanh.f32 %v167_v28  ;;  %v170_v33 = vadd.f32 %v994_v16, %v169_v31 }
 0x112   :  { %v1114_v34 = vpop.eup %1113  ;;  %1125 = vtanh.f32 %v178_v30 }
 0x113   :  { %v1116_v35 = vpop.eup %1115  ;;  %1127 = vtanh.f32 %v170_v33  ;;  %v198_v36 = vmul.f32 %v1114_v34, %v1005_v32 }
 0x114   :  { %v1118_v37 = vpop.eup %1117  ;;  %v196_v38 = vmul.f32 %v1116_v35, %v1005_v32 }
 0x115   :  { %v1120_v39 = vpop.eup %1119  ;;  %v210_v40 = vsel %vm103_vm0, %v198_v36, 0.0  ;;  %v199_v41 = vmul.f32 %v1118_v37, %v1005_v32 }
 0x116   :  { %211 = vadd.xlane.f32.xlu1 %v210_v40  ;;  %v204_v42 = vsel %vm103_vm0, %v196_v38, 0.0  ;;  %v197_v43 = vmul.f32 %v1120_v39, %v1005_v32  ;;  %v310_v40 = vsub.s32 0, %v1326_v2 }
 0x117   :  { %205 = vadd.xlane.f32.xlu0 %v204_v42  ;;  %v213_v44 = vsel %vm103_vm0, %v199_v41, 0.0  ;;  %v314_v41 = vsub.s32 1, %v1326_v2  ;;  %v338_v42 = vsub.s32 7, %v1326_v2 }
 0x118   :  { %v207_v46 = vsel %vm103_vm0, %v197_v43, 0.0  ;;  %v318_v43 = vsub.s32 2, %v1326_v2 }
 0x11a   :  { %v1122_v45 = vpop.eup %1121  ;;  %214 = vadd.xlane.f32.xlu1 %v213_v44 }
 0x11b   :  { %v1124_v47 = vpop.eup %1123  ;;  %208 = vadd.xlane.f32.xlu0 %v207_v46  ;;  %v202_v48 = vmul.f32 %v1122_v45, %v1005_v32 }
 0x11c   :  { %v1126_v49 = vpop.eup %1125  ;;  %v200_v53 = vmul.f32 %v1124_v47, %v1005_v32 }
 0x11d   :  { %v1128_v50 = vpop.eup %1127  ;;  %v222_v51 = vsel %vm103_vm0, %v202_v48, 0.0  ;;  %v203_v55 = vmul.f32 %v1126_v49, %v1005_v32  ;;  %v322_v48 = vsub.s32 3, %v1326_v2 }
 0x11e   :  { %v201_v52 = vmul.f32 %v1128_v50, %v1005_v32  ;;  %v216_v56 = vsel %vm103_vm0, %v200_v53, 0.0  ;;  %v326_v53 = vsub.s32 4, %v1326_v2 }
 0x11f   :  { %223 = vadd.xlane.f32.xlu0 %v222_v51  ;;  %v225_v57 = vsel %vm103_vm0, %v203_v55, 0.0 }
 0x120   :  { %v219_v54 = vsel %vm103_vm0, %v201_v52, 0.0 }
 0x121   :  { %220 = vadd.xlane.f32.xlu1 %v219_v54 }
 0x123   :  { %217 = vadd.xlane.f32.xlu0 %v216_v56 }
 0x125   :  { %226 = vadd.xlane.f32.xlu1 %v225_v57 }
 0x139   :  { %235 = vperm.xlu0 %1105, %v1006_v58   ;;  %v330_v58 = vsub.s32 5, %v1326_v2 }
 0x1a3   :  { %v212_v61 = vpop.xlane.xlu1 %211 }
 0x1a4   :  { %v206_v59 = vpop.xlane.xlu0 %205 }
 0x1a7   :  { %v215_v0 = vpop.xlane.xlu1 %214 }
 0x1a8   :  { %v209_v60 = vpop.xlane.xlu0 %208 }
 0x1ac   :  { %v224_v62 = vpop.xlane.xlu0 %223 }
 0x1ae   :  { %v221_v10 = vpop.xlane.xlu1 %220 }
 0x1b0   :  { %v218_v5 = vpop.xlane.xlu0 %217 }
 0x1b2   :  { %v227_v24 = vpop.xlane.xlu1 %226 }
 0x1b8   :  { %v236_v14 = vpop.permute.xlu0 %235 }
 0x1b9   :  { %v238_v15 = vadd.f32 %v236_v14, %v206_v59  ;;  %v239_v16 = vadd.f32 %v236_v14, %v209_v60  ;;  %v240_v17 = vadd.f32 %v236_v14, %v212_v61  ;;  %v241_v18 = vadd.f32 %v236_v14, %v215_v0 }
 0x1ba   :  { %v1331_v19 = vadd.f32 %v236_v14, %v218_v5  ;;  %v1333_v20 = vadd.f32 %v236_v14, %v221_v10  ;;  %v1338_v25 = vadd.f32 %v236_v14, %v224_v62  ;;  %v245_v26 = vadd.f32 %v236_v14, %v227_v24 }
 0x1bb   :  { %v259_v21 = vrot.slane %v238_v15, %v1329_v11  ;;  %v263_v22 = vrot.slane %v239_v16, %v1329_v11  ;;  %v267_v23 = vrot.slane %v240_v17, %v1329_v11  ;;  %v271_v27 = vrot.slane %v241_v18, %v1329_v11 }
 0x1bc   :  { %v275_v29 = vrot.slane %v1331_v19, %v1329_v11  ;;  %v279_v31 = vrot.slane %v1333_v20, %v1329_v11  ;;  %v283_v33 = vrot.slane %v1338_v25, %v1329_v11  ;;  %v287_v35 = vrot.slane %v245_v26, %v1329_v11 }
 0x1bd   :  { %v289_v28 = vsel %vm288_vm1, %v263_v22, %v259_v21 }
 0x1be   :  { %v291_v30 = vsel %vm290_vm2, %v267_v23, %v289_v28 }
 0x1bf   :  { %v293_v32 = vsel %vm292_vm3, %v271_v27, %v291_v30 }
 0x1c0   :  { %v295_v34 = vsel %vm294_vm4, %v275_v29, %v293_v32 }
 0x1c1   :  { %v297_v36 = vsel %vm296_vm5, %v279_v31, %v295_v34 }
 0x1c2   :  { %v299_v37 = vsel %vm298_vm6, %v283_v33, %v297_v36 }
 0x1c3   :  { %v301_v38 = vsel %vm300_vm7, %v287_v35, %v299_v37 }
 0x1c4   :  { %v304_v39 = vsel %vm303_vm8, %v301_v38, -inf }
 0x1c5   :  { %305 = vmax.xlane.f32.xlu1 %v304_v39 }
 0x252   :  { %v306_v44 = vpop.xlane.xlu1 %305 }
 0x253   :  { %v311_v45 = vrot.slane %v306_v44, %v310_v40  ;;  %v315_v46 = vrot.slane %v306_v44, %v314_v41  ;;  %v339_v47 = vrot.slane %v306_v44, %v338_v42  ;;  %v319_v49 = vrot.slane %v306_v44, %v318_v43 }
 0x254   :  { %v323_v55 = vrot.slane %v306_v44, %v322_v48  ;;  %v327_v60 = vrot.slane %v306_v44, %v326_v53  ;;  %v331_v0 = vrot.slane %v306_v44, %v330_v58  ;;  %v335_v14 = vrot.slane %v306_v44, %v334_v63 }
 0x255   :  { %v348_v50 = vsub.f32 %v238_v15, %v311_v45  ;;  %v349_v51 = vsub.f32 %v239_v16, %v315_v46  ;;  %v355_v54 = vsub.f32 %v245_v26, %v339_v47  ;;  %v350_v56 = vsub.f32 %v240_v17, %v319_v49 }
 0x256   :  { %v351_v61 = vsub.f32 %v241_v18, %v323_v55  ;;  %v352_v1 = vsub.f32 %v1331_v19, %v327_v60  ;;  %v353_v15 = vsub.f32 %v1333_v20, %v331_v0  ;;  %v354_v18 = vsub.f32 %v1338_v25, %v335_v14 }
 0x257   :  { %v356_v52 = vmul.f32 1.442695, %v348_v50  ;;  %v358_v57 = vmul.f32 1.442695, %v349_v51  ;;  %v370_v59 = vmul.f32 1.442695, %v355_v54 }
 0x258   :  { %v360_v62 = vmul.f32 1.442695, %v350_v56  ;;  %v362_v5 = vmul.f32 1.442695, %v351_v61  ;;  %v364_v16 = vmul.f32 1.442695, %v352_v1 }
 0x259   :  { %1129 = vpow2.f32 %v356_v52  ;;  %v366_v21 = vmul.f32 1.442695, %v353_v15  ;;  %v368_v23 = vmul.f32 1.442695, %v354_v18 }
 0x25a   :  { %1131 = vpow2.f32 %v358_v57  ;;  %v1224_v57 = vmov 0.0  }
 0x25b   :  { %1133 = vpow2.f32 %v370_v59  ;;  %1049 = vmatprep.subr.bf16.mxu1 %v1224_v57  ;;  %1067 = vmatprep.subr.bf16.mxu0 %v1224_v57 }
 0x25c   :  { %1135 = vpow2.f32 %v360_v62  ;;  %1051 = vmatprep.mubr.msk.bf16.mxu1 %vm1225_vm10, %v1224_v57  ;;  %1069 = vmatprep.mubr.msk.bf16.mxu0 %vm1225_vm10, %v1224_v57 }
 0x25d   :  { %1137 = vpow2.f32 %v362_v5 }
 0x25e   :  { %1139 = vpow2.f32 %v364_v16 }
 0x25f   :  { %1141 = vpow2.f32 %v366_v21 }
 0x260   :  { %1143 = vpow2.f32 %v368_v23 }
 0x263   :  { %v1130_v10 = vpop.eup %1129 }
 0x264   :  { %381 = vperm.xlu1 %1106, %v1130_v10   ;;  %v1132_v17 = vpop.eup %1131 }
 0x265   :  { %v1383_v22 = vpop.eup %1133 }
 0x266   :  { %v1136_v19 = vpop.eup %1135  ;;  %402 = vperm.xlu0 %1105, %v1383_v22  }
 0x267   :  { %v1138_v24 = vpop.eup %1137 }
 0x268   :  { %384 = vperm.xlu1 %1106, %v1132_v17   ;;  %v1386_v20 = vpop.eup %1139 }
 0x269   :  { %v1389_v26 = vpop.eup %1141 }
 0x26a   :  { %v1392_v25 = vpop.eup %1143 }
 0x26c   :  { %387 = vperm.xlu1 %1106, %v1136_v19  }
 0x270   :  { %390 = vperm.xlu1 %1106, %v1138_v24  }
 0x274   :  { %393 = vperm.xlu1 %1106, %v1386_v20  }
 0x278   :  { %396 = vperm.xlu1 %1106, %v1389_v26  }
 0x27c   :  { %399 = vperm.xlu1 %1106, %v1392_v25  }
 0x2e3   :  { %v382_v27 = vpop.permute.xlu1 %381 }
 0x2e4   :  { %v407_v34 = vrot.slane %v382_v27, %v1329_v11 }
 0x2e5   :  { %v403_v44 = vpop.permute.xlu0 %402 }
 0x2e6   :  { %v435_v51 = vrot.slane %v403_v44, %v1329_v11 }
 0x2e7   :  { %v385_v28 = vpop.permute.xlu1 %384 }
 0x2e8   :  { %v411_v32 = vrot.slane %v385_v28, %v1329_v11 }
 0x2ea   :  { %v436_v38 = vsel %vm288_vm1, %v411_v32, %v407_v34 }
 0x2eb   :  { %v388_v29 = vpop.permute.xlu1 %387 }
 0x2ec   :  { %v415_v33 = vrot.slane %v388_v29, %v1329_v11 }
 0x2ee   :  { %v437_v45 = vsel %vm290_vm2, %v415_v33, %v436_v38 }
 0x2ef   :  { %v391_v30 = vpop.permute.xlu1 %390 }
 0x2f0   :  { %v419_v35 = vrot.slane %v391_v30, %v1329_v11 }
 0x2f2   :  { %v438_v46 = vsel %vm292_vm3, %v419_v35, %v437_v45 }
 0x2f3   :  { %v394_v31 = vpop.permute.xlu1 %393 }
 0x2f4   :  { %v423_v37 = vrot.slane %v394_v31, %v1329_v11 }
 0x2f6   :  { %v439_v49 = vsel %vm294_vm4, %v423_v37, %v438_v46 }
 0x2f7   :  { %v397_v36 = vpop.permute.xlu1 %396 }
 0x2f8   :  { %v427_v39 = vrot.slane %v397_v36, %v1329_v11 }
 0x2fa   :  { %v440_v52 = vsel %vm296_vm5, %v427_v39, %v439_v49  ;;  %v632_v39 = vsel %vm518_vm9, %v1290_v6, 0 }
 0x2fb   :  { %v400_v47 = vpop.permute.xlu1 %399 }
 0x2fc   :  { %v431_v50 = vrot.slane %v400_v47, %v1329_v11  ;;  %v800_v47 = vsel %vm518_vm9, %v1296_v9, 0 }
 0x2fe   :  { %v441_v54 = vsel %vm298_vm6, %v431_v50, %v440_v52  ;;  %v744_v50 = vsel %vm518_vm9, %v1294_v8, 0 }
 0x2ff   :  { %v442_v55 = vsel %vm300_vm7, %v435_v51, %v441_v54 }
 0x300   :  { %v444_v56 = vsel %vm303_vm8, %v442_v55, 0.0  ;;  %v912_v55 = vsel %vm518_vm9, %v1307_v13, 0 }
 0x301   :  { %445 = vadd.xlane.f32.xlu1 %v444_v56 }
 0x38e   :  { %v446_v59 = vpop.xlane.xlu1 %445 }
 0x38f   :  { %1145 = vrcp.f32 %v446_v59  ;;  %v856_v59 = vsel %vm518_vm9, %v1305_v12, 0 }
 0x399   :  { %v1146_v60 = vpop.eup %1145 }
 0x39a   :  { %v452_v61 = vrot.slane %v1146_v60, %v310_v40  ;;  %v456_v62 = vrot.slane %v1146_v60, %v314_v41  ;;  %v460_v5 = vrot.slane %v1146_v60, %v318_v43  ;;  %v464_v15 = vrot.slane %v1146_v60, %v322_v48 }
 0x39b   :  { %v468_v40 = vrot.slane %v1146_v60, %v326_v53  ;;  %v520_v41 = vsel %vm518_vm9, %v1284_v3, 0  ;;  %v472_v43 = vrot.slane %v1146_v60, %v330_v58  ;;  %v688_v3 = vsel %vm518_vm9, %v1292_v7, 0 }
 0x39c   :  { %v489_v0 = vmul.f32 %v1130_v10, %v452_v61  ;;  %v490_v1 = vmul.f32 %v1132_v17, %v456_v62  ;;  %v491_v21 = vmul.f32 %v1136_v19, %v460_v5  ;;  %v492_v23 = vmul.f32 %v1138_v24, %v464_v15  ;;  %1050 = vmatpush3.bf16.msra.mxu1 %v520_v41 }
 0x39d   :  { %1055 = vmatprep.subr.bf16.mxu1 %v1224_v57  ;;  %v493_v10 = vmul.f32 %v1386_v20, %v468_v40  ;;  %1068 = vmatpush3.bf16.msra.mxu0 %v688_v3  ;;  %v494_v24 = vmul.f32 %v1389_v26, %v472_v43  ;;  %v476_v58 = vrot.slane %v1146_v60, %v334_v63 }
 0x39e   :  { %v497_v14 = vpack.c.bf16 %v489_v0, %v489_v0  ;;  %v498_v18 = vpack.c.bf16 %v490_v1, %v490_v1  ;;  %v499_v28 = vpack.c.bf16 %v491_v21, %v491_v21  ;;  %v500_v53 = vpack.c.bf16 %v492_v23, %v492_v23  ;;  %1079 = vmatprep.subr.bf16.mxu0 %v1224_v57 }
 0x39f   :  { %v501_v19 = vpack.c.bf16 %v493_v10, %v493_v10  ;;  %v502_v30 = vpack.c.bf16 %v494_v24, %v494_v24  ;;  %v495_v31 = vmul.f32 %v1392_v25, %v476_v58  ;;  %v480_v20 = vrot.slane %v1146_v60, %v338_v42 }
 0x3a0   :  { %v506_v16 = vunpack.c.l.b16 %v497_v14  ;;  %v563_v27 = vunpack.c.l.b16 %v498_v18  ;;  %v619_v48 = vunpack.c.l.b16 %v499_v28  ;;  %v675_v17 = vunpack.c.l.b16 %v500_v53 }
 0x3a1   :  { %v731_v29 = vunpack.c.l.b16 %v501_v19  ;;  %v787_v7 = vunpack.c.l.b16 %v502_v30  ;;  %v503_v32 = vpack.c.bf16 %v495_v31, %v495_v31  ;;  %v496_v33 = vmul.f32 %v1383_v22, %v480_v20 }
 0x3a2   :  { %508 = vperm.xlu0 %1105, %v506_v16   ;;  %v576_v25 = vsel %vm518_vm9, %v1286_v4, 0 }
 0x3a3   :  { %v843_v34 = vunpack.c.l.b16 %v503_v32  ;;  %v504_v35 = vpack.c.bf16 %v496_v33, %v496_v33 }
 0x3a5   :  { %v899_v26 = vunpack.c.l.b16 %v504_v35 }
 0x3a6   :  { %565 = vperm.xlu0 %1105, %v563_v27  }
 0x3aa   :  { %621 = vperm.xlu0 %1105, %v619_v48  }
 0x3ae   :  { %677 = vperm.xlu0 %1105, %v675_v17  }
 0x3b2   :  { %733 = vperm.xlu0 %1105, %v731_v29  }
 0x3b6   :  { %789 = vperm.xlu0 %1105, %v787_v7  }
 0x3ba   :  { %845 = vperm.xlu0 %1105, %v843_v34  }
 0x3be   :  { %901 = vperm.xlu0 %1105, %v899_v26  }
 0x421   :  { %v509_v63 = vpop.permute.xlu0 %508 }
 0x422   :  { %v513_v36 = vrot.slane %v509_v63, %v1329_v11 }
 0x424   :  { %v514_v37 = vpack.c.b16 %v513_v36, %v513_v36 }
 0x425   :  { %v566_v2 = vpop.permute.xlu0 %565 }
 0x426   :  { %1052 = vmatmul.mubr.msk.bf16.vlgmr.msra.gmra.mrb[0].mxu1 %vm303_vm8, %v514_v37  ;;  %v570_v42 = vrot.slane %v566_v2, %v1329_v11 }
 0x427   :  { %1056 = vmatpush3.bf16.msra.mxu1 %v576_v25  ;;  %1057 = vmatprep.mubr.msk.bf16.mxu1 %vm1225_vm10, %v1224_v57 }
 0x428   :  { %1061 = vmatprep.subr.bf16.mxu1 %v1224_v57  ;;  %v571_v38 = vpack.c.b16 %v570_v42, %v570_v42 }
 0x429   :  { %v622_v22 = vpop.permute.xlu0 %621 }
 0x42a   :  { %v626_v4 = vrot.slane %v622_v22, %v1329_v11 }
 0x42c   :  { %v627_v6 = vpack.c.b16 %v626_v4, %v626_v4 }
 0x42d   :  { %v678_v44 = vpop.permute.xlu0 %677 }
 0x42e   :  { %v682_v45 = vrot.slane %v678_v44, %v1329_v11  ;;  %1058 = vmatmul.mubr.msk.bf16.vlgmr.msra.gmra.mrb[4].mxu1 %vm303_vm8, %v571_v38 }
 0x42f   :  { %1062 = vmatpush3.bf16.msra.mxu1 %v632_v39  ;;  %1063 = vmatprep.mubr.msk.bf16.mxu1 %vm1225_vm10, %v1224_v57 }
 0x430   :  { %v683_v46 = vpack.c.b16 %v682_v45, %v682_v45  ;;  %1073 = vmatprep.subr.bf16.mxu1 %v1224_v57 }
 0x431   :  { %v734_v49 = vpop.permute.xlu0 %733 }
 0x432   :  { %1070 = vmatmul.mubr.msk.bf16.vlgmr.msra.gmra.mrb[8].mxu0 %vm303_vm8, %v683_v46  ;;  %v738_v9 = vrot.slane %v734_v49, %v1329_v11 }
 0x433   :  { %1080 = vmatpush3.bf16.msra.mxu0 %v800_v47  ;;  %1081 = vmatprep.mubr.msk.bf16.mxu0 %vm1225_vm10, %v1224_v57 }
 0x434   :  { %1091 = vmatprep.subr.bf16.mxu0 %v1224_v57  ;;  %v739_v56 = vpack.c.b16 %v738_v9, %v738_v9 }
 0x435   :  { %v790_v51 = vpop.permute.xlu0 %789 }
 0x436   :  { %v794_v52 = vrot.slane %v790_v51, %v1329_v11  ;;  %1064 = vmatmul.mubr.msk.bf16.vlgmr.msra.gmra.mrb[8].mxu1 %vm303_vm8, %v627_v6 }
 0x437   :  { %1074 = vmatpush3.bf16.msra.mxu1 %v744_v50  ;;  %1075 = vmatprep.mubr.msk.bf16.mxu1 %vm1225_vm10, %v1224_v57 }
 0x438   :  { %v795_v54 = vpack.c.b16 %v794_v52, %v794_v52  ;;  %1085 = vmatprep.subr.bf16.mxu1 %v1224_v57 }
 0x439   :  { %v846_v8 = vpop.permute.xlu0 %845 }
 0x43a   :  { %1082 = vmatmul.mubr.msk.bf16.vlgmr.msra.gmra.mrb[12].mxu0 %vm303_vm8, %v795_v54  ;;  %v850_v13 = vrot.slane %v846_v8, %v1329_v11 }
 0x43b   :  { %1092 = vmatpush3.bf16.msra.mxu0 %v912_v55  ;;  %1093 = vmatprep.mubr.msk.bf16.mxu0 %vm1225_vm10, %v1224_v57 }
 0x43c   :  { %v851_v0 = vpack.c.b16 %v850_v13, %v850_v13 }
 0x43d   :  { %v902_v60 = vpop.permute.xlu0 %901 }
 0x43e   :  { %v906_v61 = vrot.slane %v902_v60, %v1329_v11  ;;  %1076 = vmatmul.mubr.msk.bf16.vlgmr.msra.gmra.mrb[12].mxu1 %vm303_vm8, %v739_v56 }
 0x43f   :  { %1086 = vmatpush3.bf16.msra.mxu1 %v856_v59  ;;  %1087 = vmatprep.mubr.msk.bf16.mxu1 %vm1225_vm10, %v1224_v57 }
 0x440   :  { %v907_v62 = vpack.c.b16 %v906_v61, %v906_v61 }
 0x442   :  { %1094 = vmatmul.mubr.msk.bf16.vlgmr.msra.gmra.mrb[16].mxu0 %vm303_vm8, %v907_v62 }
 0x446   :  { %1088 = vmatmul.mubr.msk.bf16.vlgmr.msra.gmra.mrb[16].mxu1 %vm303_vm8, %v851_v0 }
 0x4f9   :  { %v556_v1 = vpop.f32.mrb[0].mxu1 }
 0x4fa   :  { %v1053_v5 = vpop.f32.mrb[1].mxu1 }
 0x4fb   :  { %v559_v12 = vpop.f32.mrb[2].mxu1 }
 0x4fc   :  { %v1054_v14 = vpop.f32.mrb[3].mxu1 }
 0x501   :  { %v612_v15 = vpop.f32.mrb[4].mxu1 }
 0x502   :  { %v962_v16 = vrot.slane %v612_v15, 7  ;;  %v1059_v18 = vpop.f32.mrb[5].mxu1 }
 0x503   :  { %v615_v21 = vpop.f32.mrb[6].mxu1 }
 0x504   :  { %v963_v23 = vsel %vm288_vm1, %v962_v16, %v556_v1  ;;  %v1060_v40 = vpop.f32.mrb[7].mxu1 }
 0x505   :  { %v724_v57 = vpop.f32.mrb[8].mxu0 }
 0x506   :  { %v1071_v27 = vpop.f32.mrb[9].mxu0  ;;  %v966_v53 = vrot.slane %v724_v57, 5 }
 0x507   :  { %v727_v11 = vpop.f32.mrb[10].mxu0 }
 0x508   :  { %v1072_v28 = vpop.f32.mrb[11].mxu0 }
 0x509   :  { %v668_v41 = vpop.f32.mrb[8].mxu1 }
 0x50a   :  { %v964_v43 = vrot.slane %v668_v41, 6  ;;  %v1065_v48 = vpop.f32.mrb[9].mxu1 }
 0x50b   :  { %v671_v10 = vpop.f32.mrb[10].mxu1 }
 0x50c   :  { %v965_v3 = vsel %vm290_vm2, %v964_v43, %v963_v23  ;;  %v1066_v17 = vpop.f32.mrb[11].mxu1 }
 0x50d   :  { %v836_v19 = vpop.f32.mrb[12].mxu0  ;;  %v967_v24 = vsel %vm292_vm3, %v966_v53, %v965_v3 }
 0x50e   :  { %v1083_v58 = vpop.f32.mrb[13].mxu0  ;;  %v970_v32 = vrot.slane %v836_v19, 3 }
 0x50f   :  { %v839_v29 = vpop.f32.mrb[14].mxu0 }
 0x510   :  { %v1084_v30 = vpop.f32.mrb[15].mxu0 }
 0x511   :  { %v780_v31 = vpop.f32.mrb[12].mxu1 }
 0x512   :  { %v968_v20 = vrot.slane %v780_v31, 4  ;;  %v1077_v7 = vpop.f32.mrb[13].mxu1 }
 0x513   :  { %v783_v33 = vpop.f32.mrb[14].mxu1 }
 0x514   :  { %v969_v34 = vsel %vm294_vm4, %v968_v20, %v967_v24  ;;  %v1078_v35 = vpop.f32.mrb[15].mxu1 }
 0x515   :  { %v948_v26 = vpop.f32.mrb[16].mxu0  ;;  %v971_v63 = vsel %vm296_vm5, %v970_v32, %v969_v34 }
 0x516   :  { %v1095_v36 = vpop.f32.mrb[17].mxu0  ;;  %v974_v38 = vrot.slane %v948_v26, 1 }
 0x517   :  { %v951_v37 = vpop.f32.mrb[18].mxu0 }
 0x518   :  { %v1096_v25 = vpop.f32.mrb[19].mxu0 }
 0x519   :  { %v892_v2 = vpop.f32.mrb[16].mxu1 }
 0x51a   :  { %v972_v42 = vrot.slane %v892_v2, 2  ;;  %v1089_v22 = vpop.f32.mrb[17].mxu1 }
 0x51b   :  { %v895_v39 = vpop.f32.mrb[18].mxu1 }
 0x51c   :  { %v973_v44 = vsel %vm298_vm6, %v972_v42, %v971_v63  ;;  %v1090_v45 = vpop.f32.mrb[19].mxu1 }
 0x51d   :  { %v975_v4 = vsel %vm300_vm7, %v974_v38, %v973_v44 }
 0x51e   :  { %977 = vst.msk [vmem:[#allocation8] sm:$0xff] %vm103_vm0, %v975_v4 }
 0x51f   :  { %1202 = shalt.err (!%p1199_p6)
}
 0x520   :  { %s1203_s25 = scalar_lea.hbm %s1512_s5, 128 }
 0x521   :  { %p1204_p7 = scmp.ne.s32.totalorder %s1512_s5, %s1203_s25  ;;  %p1207_p8 = scmp.lt.u32.totalorder %s1203_s25, %s1512_s5 }
 0x523   :  { %p1209_p9 = pnand %p1207_p8, %p1204_p7 }
 0x525   :  { %1212 = shalt.err (!%p1209_p9)
}
 0x526   :  { %987 = dma.vmem_to_hbm [thread:$0]  %s985_s21, 128, %s1512_s5, [#allocation5]  }
 0x527   :  { %1217 = dma.done.wait [#allocation5], 128  }
 0x528   :  { %1218 = vsyncadd [#allocation5], 4294967168 }
 0x529   :  { %991 = vsyncpa [#allocation4], 1 }
 0x52a   :  { %992 = vsyncpa [#allocation7], 1 }
 0x52b   :  { %993 = vsyncpa [#allocation5], 1 }

</bundles_post_ra>
